<compile_context>
chip_gen: v7x
topology: tpu7x:2x2x1
jax: 0.10.0
libtpu: 0.0.40
codegen_flags: <defaults>
</compile_context>

<pallas_src>
import functools

import jax
import jax.numpy as jnp
from jax.experimental import pallas as pl
from jax.experimental.pallas import tpu as pltpu


# -----------------------------------------------------------------------------
# Kernel
# -----------------------------------------------------------------------------
def _branch_kernel(x_ref, w1_ref, b1_ref, w2_ref, b2_ref, w3_ref, b3_ref, o_ref,
                   *, nb, matmul_dtype):
    """One grid step: `nb` batch images x one spatial (lane) tile.

    Channels sit on sublanes, the flattened spatial axis on lanes, so every
    1x1 conv is a plain (out_ch, in_ch) @ (in_ch, TM) MXU matmul.  Weights
    arrive pre-cast to `matmul_dtype`; accumulation is always f32.
    """
    w1 = w1_ref[...]
    w2 = w2_ref[...]
    w3 = w3_ref[...]
    b1 = b1_ref[...]
    b2 = b2_ref[...]
    b3 = b3_ref[...]

    for n in range(nb):                                  # nb is small & static
        xm = x_ref[n].astype(matmul_dtype)               # (C, TM); no-op on f32

        # attention: Conv1x1 -> ReLU -> Conv1x1 -> Sigmoid
        h = jnp.dot(w1, xm, preferred_element_type=jnp.float32) + b1
        h = jnp.maximum(h, 0.0)
        a = jnp.dot(w2, h.astype(matmul_dtype),
                    preferred_element_type=jnp.float32) + b2
        # sigmoid(a) == 0.5*tanh(0.5*a)+0.5 : a single EUP op per element.
        attn = 0.5 * jnp.tanh(0.5 * a) + 0.5             # (C, TM), f32

        # projection: Conv1x1 on (x * attn); multiply done in matmul_dtype.
        xa = xm * attn.astype(matmul_dtype)
        y = jnp.dot(w3, xa, preferred_element_type=jnp.float32) + b3
        o_ref[n] = y.astype(o_ref.dtype)


# -----------------------------------------------------------------------------
# Tiling helpers
# -----------------------------------------------------------------------------
def _vmem_capacity_bytes():
    try:
        return int(pltpu.get_tpu_info().vmem_capacity_bytes)
    except Exception:
        return 64 * 1024 * 1024          # conservative default (v7x per-TC VMEM)


def _const_spec(shape):
    """Full-array block, constant index map; single-buffered where supported."""
    index_map = lambda n, s: (0,) * len(shape)
    try:
        return pl.BlockSpec(shape, index_map, pipeline_mode=pl.Buffered(1))
    except (TypeError, AttributeError):   # older Pallas without pipeline_mode
        return pl.BlockSpec(shape, index_map)


def _choose_tiling(N, C, hid, Cout, S_pad, x_bytes, out_bytes, tile_m, vmem_cap):
    """Pick (nb, tm) so double-buffered blocks + f32 temporaries fit VMEM."""
    budget = int(vmem_cap * 0.6)
    weight_bytes = (hid * C + C * hid + Cout * C) * 4 + (hid + C + Cout) * 4

    def step_bytes(nb, tm):
        blocks = 2 * nb * tm * (C * x_bytes + Cout * out_bytes)  # dbl-buffered
        temps = 4 * tm * (3 * C + hid + Cout)                    # f32 live temps
        return blocks + temps + weight_bytes

    user_cap = None
    if tile_m is not None:
        user_cap = max(128, (int(tile_m) // 128) * 128)

    if S_pad <= 512:
        # Small images: one spatial tile, amortize overhead over several n,
        # but keep at least 2 grid points so both v7x TensorCores get work.
        tm = S_pad
        nb = 1
        for cand in (8, 4, 2):
            if N % cand == 0 and N // cand >= 2 and step_bytes(cand, tm) <= budget:
                nb = cand
                break
    else:
        nb = 1
        tm = min(user_cap if user_cap is not None else 2048, S_pad)
        while tm > 128 and step_bytes(nb, tm) > budget:
            tm -= 128
        tm = max(128, (tm // 128) * 128)

    if user_cap is not None:
        tm = max(128, min(tm, user_cap))

    # Megacore guard: never leave a (1,1) grid if the spatial axis can split.
    if (N // nb) * pl.cdiv(S_pad, tm) < 2 and S_pad >= 256:
        tm = max(128, ((S_pad // 2) // 128) * 128)
    return nb, tm


# -----------------------------------------------------------------------------
# Wrapper
# -----------------------------------------------------------------------------
@functools.partial(jax.jit, static_argnames=("tile_m", "matmul_dtype", "out_dtype"))
def individual_branch(x, params, tile_m=None, matmul_dtype=jnp.bfloat16,
                      out_dtype=None):
    """Fused forward of `IndividualBranch`.

    x: (N, C, H, W).  params: w1 (C//8, C), b1 (C//8, 1), w2 (C, C//8),
    b2 (C, 1), w3 (256, C), b3 (256, 1).
    matmul_dtype: MXU operand dtype (bf16 default; jnp.float32 for strict
    parity with PyTorch).  out_dtype defaults to x.dtype.
    Passing x already in bf16 removes the in-kernel cast and halves its HBM read.
    """
    N, C, H, W = x.shape
    S = H * W
    out_dtype = x.dtype if out_dtype is None else out_dtype

    # Hoist weight casts out of the kernel; biases stay f32.
    w1 = params["w1"].astype(matmul_dtype)
    w2 = params["w2"].astype(matmul_dtype)
    w3 = params["w3"].astype(matmul_dtype)
    b1 = params["b1"].astype(jnp.float32)
    b2 = params["b2"].astype(jnp.float32)
    b3 = params["b3"].astype(jnp.float32)
    hid, Cout = w1.shape[0], w3.shape[0]

    x3 = x.reshape(N, C, S)                       # metadata-only reshape
    # Keep the lane-dense (128-multiple) fast path: pad spatial if needed.
    S_pad = ((S + 127) // 128) * 128
    if S_pad != S:
        x3 = jnp.pad(x3, ((0, 0), (0, 0), (0, S_pad - S)))

    vmem_cap = _vmem_capacity_bytes()
    nb, tm = _choose_tiling(N, C, hid, Cout, S_pad,
                            x_bytes=x3.dtype.itemsize,
                            out_bytes=jnp.dtype(out_dtype).itemsize,
                            tile_m=tile_m, vmem_cap=vmem_cap)
    grid = (N // nb, pl.cdiv(S_pad, tm))

    kernel = functools.partial(_branch_kernel, nb=nb, matmul_dtype=matmul_dtype)

    out3 = pl.pallas_call(
        kernel,
        out_shape=jax.ShapeDtypeStruct((N, Cout, S_pad), out_dtype),
        grid_spec=pltpu.PrefetchScalarGridSpec(
            num_scalar_prefetch=0,
            grid=grid,
            in_specs=[
                pl.BlockSpec((nb, C, tm), lambda n, s: (n, 0, s)),   # x tiles
                _const_spec(w1.shape), _const_spec(b1.shape),
                _const_spec(w2.shape), _const_spec(b2.shape),
                _const_spec(w3.shape), _const_spec(b3.shape),
            ],
            out_specs=pl.BlockSpec((nb, Cout, tm), lambda n, s: (n, 0, s)),
        ),
        compiler_params=pltpu.CompilerParams(
            dimension_semantics=("parallel", "parallel"),
            vmem_limit_bytes=min(int(vmem_cap * 0.75), 100 * 1024 * 1024),
        ),
    )(x3, w1, b1, w2, b2, w3, b3)

    if S_pad != S:
        out3 = out3[:, :, :S]
    return out3.reshape(N, Cout, H, W)            # metadata-only reshape back


# -----------------------------------------------------------------------------
# Params / reference
# -----------------------------------------------------------------------------
def init_params(key, in_dim, out_dim=256, dtype=jnp.float32):
    """PyTorch-style Conv2d(k=1) params stored in (out_ch, in_ch) matmul form."""
    hid = in_dim // 8
    ks = jax.random.split(key, 6)
    s1 = 1.0 / jnp.sqrt(in_dim)   # fan_in = in_dim for conv1 & conv3
    s2 = 1.0 / jnp.sqrt(hid)      # fan_in = in_dim//8 for conv2
    return {
        "w1": jax.random.uniform(ks[0], (hid, in_dim), dtype, -s1, s1),
        "b1": jax.random.uniform(ks[1], (hid, 1), dtype, -s1, s1),
        "w2": jax.random.uniform(ks[2], (in_dim, hid), dtype, -s2, s2),
        "b2": jax.random.uniform(ks[3], (in_dim, 1), dtype, -s2, s2),
        "w3": jax.random.uniform(ks[4], (out_dim, in_dim), dtype, -s1, s1),
        "b3": jax.random.uniform(ks[5], (out_dim, 1), dtype, -s1, s1),
    }


def _reference(x, p):
    # Pure-JAX reference of the PyTorch forward (1x1 convs as matmuls), NCHW.
    N, C, H, W = x.shape
    xm = x.reshape(N, C, H * W)
    h = jnp.maximum(jnp.einsum("oc,ncs->nos", p["w1"], xm) + p["b1"][None], 0.0)
    attn = jax.nn.sigmoid(jnp.einsum("oc,ncs->nos", p["w2"], h) + p["b2"][None])
    y = jnp.einsum("oc,ncs->nos", p["w3"], xm * attn) + p["b3"][None]
    return y.reshape(N, -1, H, W)


if __name__ == "__main__":
    key = jax.random.PRNGKey(0)
    k_x, k_p = jax.random.split(key)

    N, C, H, W = 2, 32, 16, 16            # in_dim=32 (divisible by 8), H*W=256
    x = jax.random.normal(k_x, (N, C, H, W), dtype=jnp.float32)
    params = init_params(k_p, in_dim=C)

    ref = _reference(x, params)

    # Strict-parity path: f32 MXU operands + f32 output match PyTorch exactly.
    out = jax.block_until_ready(
        individual_branch(x, params, matmul_dtype=jnp.float32,
                          out_dtype=jnp.float32))
    assert out.shape == (N, 256, H, W), out.shape
    err = float(jnp.max(jnp.abs(out - ref)))
    assert jnp.allclose(out, ref, atol=1e-4, rtol=1e-4), err

    # Production default: bf16 MXU operands (f32 accumulation, f32 ReLU/sigmoid)
    # + bf16 output.  Expected error ~1e-2 relative vs the f32 reference.
    out_fast = jax.block_until_ready(
        individual_branch(x, params, out_dtype=jnp.bfloat16))
    assert out_fast.shape == (N, 256, H, W)
    assert jnp.allclose(out_fast.astype(jnp.float32), ref, atol=2e-1, rtol=2e-1)

    print("KERNEL_OK")
</pallas_src>

<mosaic_0001>
module attributes {stable_mosaic.version = 11 : i64} {
  func.func @_branch_kernel(%arg0: i32, %arg1: i32, %arg2: memref<1x32x256xf32, #tpu.memory_space<vmem>>, %arg3: memref<4x32xf32, #tpu.memory_space<vmem>>, %arg4: memref<4x1xf32, #tpu.memory_space<vmem>>, %arg5: memref<32x4xf32, #tpu.memory_space<vmem>>, %arg6: memref<32x1xf32, #tpu.memory_space<vmem>>, %arg7: memref<256x32xf32, #tpu.memory_space<vmem>>, %arg8: memref<256x1xf32, #tpu.memory_space<vmem>>, %arg9: memref<1x256x256xf32, #tpu.memory_space<vmem>>) attributes {dimension_semantics = [#tpu.dimension_semantics<parallel>, #tpu.dimension_semantics<parallel>], iteration_bounds = array<i64: 2, 1>, scalar_prefetch = 0 : i64, scratch_operands = 0 : i64, tpu.core_type = #tpu.core_type<tc>, window_params = [{transform_indices = @transform_0, window_bounds = array<i64: 1, 32, 256>}, {pipeline_mode = #tpu.pipeline_mode<synchronous>, transform_indices = @transform_1, window_bounds = array<i64: 4, 32>}, {pipeline_mode = #tpu.pipeline_mode<synchronous>, transform_indices = @transform_2, window_bounds = array<i64: 4, 1>}, {pipeline_mode = #tpu.pipeline_mode<synchronous>, transform_indices = @transform_3, window_bounds = array<i64: 32, 4>}, {pipeline_mode = #tpu.pipeline_mode<synchronous>, transform_indices = @transform_4, window_bounds = array<i64: 32, 1>}, {pipeline_mode = #tpu.pipeline_mode<synchronous>, transform_indices = @transform_5, window_bounds = array<i64: 256, 32>}, {pipeline_mode = #tpu.pipeline_mode<synchronous>, transform_indices = @transform_6, window_bounds = array<i64: 256, 1>}, {transform_indices = @transform_7, window_bounds = array<i64: 1, 256, 256>}]} {
    %c0 = arith.constant 0 : index
    %c0_0 = arith.constant 0 : index
    %0 = vector.load %arg3[%c0, %c0_0] : memref<4x32xf32, #tpu.memory_space<vmem>>, vector<4x32xf32>
    %c0_1 = arith.constant 0 : index
    %c0_2 = arith.constant 0 : index
    %1 = vector.load %arg5[%c0_1, %c0_2] : memref<32x4xf32, #tpu.memory_space<vmem>>, vector<32x4xf32>
    %c0_3 = arith.constant 0 : index
    %c0_4 = arith.constant 0 : index
    %2 = vector.load %arg7[%c0_3, %c0_4] : memref<256x32xf32, #tpu.memory_space<vmem>>, vector<256x32xf32>
    %c0_5 = arith.constant 0 : index
    %c0_6 = arith.constant 0 : index
    %3 = vector.load %arg4[%c0_5, %c0_6] : memref<4x1xf32, #tpu.memory_space<vmem>>, vector<4x1xf32>
    %c0_7 = arith.constant 0 : index
    %c0_8 = arith.constant 0 : index
    %4 = vector.load %arg6[%c0_7, %c0_8] : memref<32x1xf32, #tpu.memory_space<vmem>>, vector<32x1xf32>
    %c0_9 = arith.constant 0 : index
    %c0_10 = arith.constant 0 : index
    %5 = vector.load %arg8[%c0_9, %c0_10] : memref<256x1xf32, #tpu.memory_space<vmem>>, vector<256x1xf32>
    %c0_11 = arith.constant 0 : index
    %c0_12 = arith.constant 0 : index
    %c0_13 = arith.constant 0 : index
    %6 = vector.load %arg2[%c0_11, %c0_12, %c0_13] : memref<1x32x256xf32, #tpu.memory_space<vmem>>, vector<1x32x256xf32>
    %7 = vector.shape_cast %6 : vector<1x32x256xf32> to vector<32x256xf32>
    %cst = arith.constant dense<0.000000e+00> : vector<4x256xf32>
    %8 = tpu.matmul %0, %7, %cst {dimension_numbers = #tpu.dot_dimension_numbers<[1], [0], [0], [1], [0, 0, 1, 1], [], []>} : vector<4x32xf32>, vector<32x256xf32>, vector<4x256xf32> -> vector<4x256xf32>
    %9 = vector.broadcast %3 : vector<4x1xf32> to vector<4x256xf32>
    %10 = arith.addf %8, %9 : vector<4x256xf32>
    %cst_14 = arith.constant 0.000000e+00 : f32
    %11 = vector.broadcast %cst_14 : f32 to vector<4x256xf32>
    %12 = arith.maximumf %10, %11 : vector<4x256xf32>
    %cst_15 = arith.constant dense<0.000000e+00> : vector<32x256xf32>
    %13 = tpu.matmul %1, %12, %cst_15 {dimension_numbers = #tpu.dot_dimension_numbers<[1], [0], [0], [1], [0, 0, 1, 1], [], []>} : vector<32x4xf32>, vector<4x256xf32>, vector<32x256xf32> -> vector<32x256xf32>
    %14 = vector.broadcast %4 : vector<32x1xf32> to vector<32x256xf32>
    %15 = arith.addf %13, %14 : vector<32x256xf32>
    %cst_16 = arith.constant 5.000000e-01 : f32
    %16 = vector.broadcast %cst_16 : f32 to vector<32x256xf32>
    %17 = arith.mulf %16, %15 : vector<32x256xf32>
    %18 = math.tanh %17 : vector<32x256xf32>
    %cst_17 = arith.constant 5.000000e-01 : f32
    %19 = vector.broadcast %cst_17 : f32 to vector<32x256xf32>
    %20 = arith.mulf %19, %18 : vector<32x256xf32>
    %cst_18 = arith.constant 5.000000e-01 : f32
    %21 = vector.broadcast %cst_18 : f32 to vector<32x256xf32>
    %22 = arith.addf %20, %21 : vector<32x256xf32>
    %23 = arith.mulf %7, %22 : vector<32x256xf32>
    %cst_19 = arith.constant dense<0.000000e+00> : vector<256x256xf32>
    %24 = tpu.matmul %2, %23, %cst_19 {dimension_numbers = #tpu.dot_dimension_numbers<[1], [0], [0], [1], [0, 0, 1, 1], [], []>} : vector<256x32xf32>, vector<32x256xf32>, vector<256x256xf32> -> vector<256x256xf32>
    %25 = vector.broadcast %5 : vector<256x1xf32> to vector<256x256xf32>
    %26 = arith.addf %24, %25 : vector<256x256xf32>
    %c0_20 = arith.constant 0 : index
    %c0_21 = arith.constant 0 : index
    %c0_22 = arith.constant 0 : index
    %27 = vector.load %arg9[%c0_20, %c0_21, %c0_22] : memref<1x256x256xf32, #tpu.memory_space<vmem>>, vector<1x256x256xf32>
    %28 = vector.shape_cast %27 : vector<1x256x256xf32> to vector<256x256xf32>
    %29 = vector.shape_cast %26 : vector<256x256xf32> to vector<1x256x256xf32>
    tpu.vector_store %arg9[%c0_20, %c0_21, %c0_22], %29 {strides = array<i32>} : memref<1x256x256xf32, #tpu.memory_space<vmem>>, vector<1x256x256xf32>,
    return
  }
  func.func @transform_0(%arg0: i32, %arg1: i32) -> (i32, i32, i32) {
    %c0_i32 = arith.constant 0 : i32
    %c0_i32_0 = arith.constant 0 : i32
    return %arg0, %c0_i32, %arg1 : i32, i32, i32
  }
  func.func @transform_1(%arg0: i32, %arg1: i32) -> (i32, i32) {
    %c0_i32 = arith.constant 0 : i32
    %c0_i32_0 = arith.constant 0 : i32
    %c0_i32_1 = arith.constant 0 : i32
    return %c0_i32, %c0_i32_0 : i32, i32
  }
  func.func @transform_2(%arg0: i32, %arg1: i32) -> (i32, i32) {
    %c0_i32 = arith.constant 0 : i32
    %c0_i32_0 = arith.constant 0 : i32
    %c0_i32_1 = arith.constant 0 : i32
    return %c0_i32, %c0_i32_0 : i32, i32
  }
  func.func @transform_3(%arg0: i32, %arg1: i32) -> (i32, i32) {
    %c0_i32 = arith.constant 0 : i32
    %c0_i32_0 = arith.constant 0 : i32
    %c0_i32_1 = arith.constant 0 : i32
    return %c0_i32, %c0_i32_0 : i32, i32
  }
  func.func @transform_4(%arg0: i32, %arg1: i32) -> (i32, i32) {
    %c0_i32 = arith.constant 0 : i32
    %c0_i32_0 = arith.constant 0 : i32
    %c0_i32_1 = arith.constant 0 : i32
    return %c0_i32, %c0_i32_0 : i32, i32
  }
  func.func @transform_5(%arg0: i32, %arg1: i32) -> (i32, i32) {
    %c0_i32 = arith.constant 0 : i32
    %c0_i32_0 = arith.constant 0 : i32
    %c0_i32_1 = arith.constant 0 : i32
    return %c0_i32, %c0_i32_0 : i32, i32
  }
  func.func @transform_6(%arg0: i32, %arg1: i32) -> (i32, i32) {
    %c0_i32 = arith.constant 0 : i32
    %c0_i32_0 = arith.constant 0 : i32
    %c0_i32_1 = arith.constant 0 : i32
    return %c0_i32, %c0_i32_0 : i32, i32
  }
  func.func @transform_7(%arg0: i32, %arg1: i32) -> (i32, i32, i32) {
    %c0_i32 = arith.constant 0 : i32
    %c0_i32_0 = arith.constant 0 : i32
    return %arg0, %c0_i32, %arg1 : i32, i32, i32
  }
}

</mosaic_0001>

<bundles_post_ra>
// kernel: individual_branch.1
= control target key start
LH: loop header
LB: loop body
LE: loop exit
PB: predicated region body
PF: predicated region fallthrough
CT: control target
= control target key end

     0   :  { %s1497_s24 = smov 0   ;;  %s1499_s25 = smov 0   ;;  %s1976_s0 = inlined_call_operand.vmem [shape: f32[2,32,256], index: 0, kind: input, shape index: {}]   ;;  %s1977_s1 = inlined_call_operand.vmem [shape: f32[4,32], index: 1, kind: input, shape index: {}]   ;;  %s1978_s2 = inlined_call_operand.vmem [shape: f32[4,1], index: 2, kind: input, shape index: {}]   ;;  %s1979_s3 = inlined_call_operand.vmem [shape: f32[32,4], index: 3, kind: input, shape index: {}]   ;;  %s1980_s4 = inlined_call_operand.vmem [shape: f32[32,1], index: 4, kind: input, shape index: {}]   ;;  %s1981_s5 = inlined_call_operand.vmem [shape: f32[256,32], index: 5, kind: input, shape index: {}]   ;;  %s1982_s6 = inlined_call_operand.vmem [shape: f32[256,1], index: 6, kind: input, shape index: {}]   ;;  %s1983_s7 = inlined_call_operand.vmem [shape: f32[2,256,256], index: 7, kind: output, shape index: {}]  }
   0x1   :  { %s1501_s26 = smov 0  }
   0x2 LB: > { %s29_s27 = sadd.s32 1, %s1449_s25  ;;  %p1319_p0 = scmp.ge.s32.totalorder %s1453_s26, 1  ;;  %s1453_s26 = sphi %s1501_s26, %s17_s26   ;;  %s1449_s25 = sphi %s1499_s25, %s1985_s25   ;;  %s1445_s24 = sphi %s1497_s24, %s1984_s24  }
   0x3   : > { %p31_p1 = scmp.ge.s32.totalorder %s29_s27, 2  ;;  %p258_p2 = scmp.lt.s32.totalorder %s1453_s26, 3 }
   0x5   : > { %s1987_s27 = smov (%p31_p1, %s29_s27), 0  ;;  %p259_p3 = pnand %p1319_p0, %p258_p2 }
   0x6   : > { %p299_p4 = scmp.lt.s32.totalorder (!%p259_p3), %s1445_s24, 1  ;;  %v1455_v0 = vmov (!%p259_p3), 0.0   ;;  %v1456_v1 = vmov (!%p259_p3), 0   ;;  %v355_v2 = vld [vmem:[%s1978_s2] sm:$0xf] (!%p259_p3)  ;;  %v359_v4 = vld [vmem:[%s1980_s4 + $0x18] sm:$0xff] (!%p259_p3) }
   0x7   : > { %262 = sbr.rel (%p259_p3) target bundleno = 779 (0x30b), region = 48  ;;  %473 = vmatprep.mubr.f32.mxu0 (!%p259_p3), %v1455_v0  ;;  %1413 = vset.pattern.permute.xlu0 (!%p259_p3), %v1456_v1  ;;  %v356_v3 = vld [vmem:[%s1980_s4] sm:$0xff] (!%p259_p3)  ;;  %v361_v17 = vld [vmem:[%s1982_s6 + $0x8] sm:$0xff] (!%p259_p3)  ;;  %vm405_vm0 = vcmask (!%p259_p3), 261120   ;;  %v363_v19 = vld [vmem:[%s1982_s6 + $0x18] sm:$0xff] (!%p259_p3)  ;;  %vm515_vm1 = vcmask (!%p259_p3), 1043456  }
   0x8   : > { %402 = vperm.xlu0 (!%p259_p3), %1413, %v355_v2   ;;  %586 = vmatprep.mubr.f32.mxu1 (!%p259_p3), %v1455_v0  ;;  %v318_v18 = vld [vmem:[%s1977_s1] sm:$0xf] (!%p259_p3)  ;;  %v365_v20 = vld [vmem:[%s1982_s6 + $0x28] sm:$0xff] (!%p259_p3)  ;;  %v367_v21 = vld [vmem:[%s1982_s6 + $0x38] sm:$0xff] (!%p259_p3)  ;;  %vm502_vm2 = vcmask (!%p259_p3), 31744  }
   0x9   : > { %1414 = vset.pattern.permute.xlu1 (!%p259_p3), %v1456_v1  ;;  %v369_v22 = vld [vmem:[%s1982_s6 + $0x48] sm:$0xff] (!%p259_p3)  ;;  %v371_v23 = vld [vmem:[%s1982_s6 + $0x58] sm:$0xff] (!%p259_p3)  ;;  %v358_v35 = vld [vmem:[%s1980_s4 + $0x10] sm:$0xff] (!%p259_p3) }
   0xa   : > { %v373_v24 = vld [vmem:[%s1982_s6 + $0x68] sm:$0xff] (!%p259_p3)  ;;  %v375_v25 = vld [vmem:[%s1982_s6 + $0x78] sm:$0xff] (!%p259_p3)  ;;  %v360_v36 = vld [vmem:[%s1982_s6] sm:$0xff] (!%p259_p3) }
   0xb   : > { %v377_v26 = vld [vmem:[%s1982_s6 + $0x88] sm:$0xff] (!%p259_p3)  ;;  %v379_v27 = vld [vmem:[%s1982_s6 + $0x98] sm:$0xff] (!%p259_p3)  ;;  %v362_v37 = vld [vmem:[%s1982_s6 + $0x10] sm:$0xff] (!%p259_p3) }
   0xc   : > { %484 = vperm.xlu0 (!%p259_p3), %1413, %v356_v3   ;;  %v381_v28 = vld [vmem:[%s1982_s6 + $0xa8] sm:$0xff] (!%p259_p3)  ;;  %v383_v29 = vld [vmem:[%s1982_s6 + $0xb8] sm:$0xff] (!%p259_p3)  ;;  %v364_v38 = vld [vmem:[%s1982_s6 + $0x20] sm:$0xff] (!%p259_p3) }
   0xd   : > { %v385_v30 = vld [vmem:[%s1982_s6 + $0xc8] sm:$0xff] (!%p259_p3)  ;;  %v387_v31 = vld [vmem:[%s1982_s6 + $0xd8] sm:$0xff] (!%p259_p3)  ;;  %v366_v39 = vld [vmem:[%s1982_s6 + $0x30] sm:$0xff] (!%p259_p3) }
   0xe   : > { %s1989_s24 = smov (!%p299_p4, %s1445_s24), 1  ;;  %v389_v32 = vld [vmem:[%s1982_s6 + $0xe8] sm:$0xff]  ;;  %v391_v33 = vld [vmem:[%s1982_s6 + $0xf8] sm:$0xff]  ;;  %v368_v40 = vld [vmem:[%s1982_s6 + $0x40] sm:$0xff] }
   0xf   : > { %s1365_s9 = sshll.u32 %s1989_s24, 6  ;;  %v357_v34 = vld [vmem:[%s1980_s4 + $0x8] sm:$0xff]  ;;  %v370_v41 = vld [vmem:[%s1982_s6 + $0x50] sm:$0xff]  ;;  %v372_v42 = vld [vmem:[%s1982_s6 + $0x60] sm:$0xff]  ;;  %s1366_s28 = sshll.u32 %s1989_s24, 9 }
  0x10   : > { %s306_s12 = scalar_lea.vmem %s1976_s0, %s1365_s9  ;;  %499 = vperm.xlu0 %1413, %v359_v4   ;;  %489 = vperm.xlu1 %1414, %v357_v34   ;;  %v374_v43 = vld [vmem:[%s1982_s6 + $0x70] sm:$0xff]  ;;  %v376_v44 = vld [vmem:[%s1982_s6 + $0x80] sm:$0xff]  ;;  %v320_v60 = vld [vmem:[%s1979_s3 + $0x8] sm:$0xff]  ;;  %s1875_s8 = scalar_lea.vmem %s1983_s7, %s1366_s28 }
  0x11   : > { %v1532_v5 = vld [vmem:[%s306_s12 + $0x8] sm:$0xff]  ;;  %v1534_v6 = vld [vmem:[%s306_s12 + $0x18] sm:$0xff]  ;;  %v1536_v7 = vld [vmem:[%s306_s12] sm:$0xff] }
  0x12   : > { %v1367_v8 = vpack.c.bf16 %v1534_v6, %v1532_v5  ;;  %v1540_v9 = vld [vmem:[%s306_s12 + $0x10] sm:$0xff]  ;;  %v1542_v10 = vld [vmem:[%s306_s12 + $0x28] sm:$0xff]  ;;  %v1544_v11 = vld [vmem:[%s306_s12 + $0x38] sm:$0xff] }
  0x13   : > { %v1369_v12 = vpack.c.bf16 %v1540_v9, %v1536_v7  ;;  %v1371_v13 = vpack.c.bf16 %v1544_v11, %v1542_v10  ;;  %v1550_v14 = vld [vmem:[%s306_s12 + $0x20] sm:$0xff]  ;;  %v1552_v15 = vld [vmem:[%s306_s12 + $0x30] sm:$0xff]  ;;  %v322_v62 = vld [vmem:[%s1979_s3 + $0x18] sm:$0xff] }
  0x14   : > { %1368 = vmatprep.subr.bf16.mxu0 %v1367_v8  ;;  %v1373_v16 = vpack.c.bf16 %v1552_v15, %v1550_v14  ;;  %658 = vperm.xlu0 %1413, %v361_v17   ;;  %v378_v45 = vld [vmem:[%s1982_s6 + $0x90] sm:$0xff]  ;;  %v380_v46 = vld [vmem:[%s1982_s6 + $0xa0] sm:$0xff] }
  0x15   : > { %1370 = vmatpush1.bf16.msra.mxu0 %v1369_v12  ;;  %494 = vperm.xlu1 %1414, %v358_v35   ;;  %v382_v47 = vld [vmem:[%s1982_s6 + $0xb0] sm:$0xff]  ;;  %v384_v48 = vld [vmem:[%s1982_s6 + $0xc0] sm:$0xff] }
  0x16   : > { %1372 = vmatprep.subr.bf16.mxu0 %v1371_v13  ;;  %v386_v49 = vld [vmem:[%s1982_s6 + $0xd0] sm:$0xff]  ;;  %v388_v50 = vld [vmem:[%s1982_s6 + $0xe0] sm:$0xff] }
  0x17   : > { %v390_v51 = vld [vmem:[%s1982_s6 + $0xf0] sm:$0xff]  ;;  %v319_v59 = vld [vmem:[%s1979_s3] sm:$0xff] }
  0x18   : > { %668 = vperm.xlu0 %1413, %v363_v19   ;;  %v321_v61 = vld [vmem:[%s1979_s3 + $0x10] sm:$0xff] }
  0x19   : > { %1374 = vmatpush1.bf16.msra.mxu0 %v1373_v16  ;;  %653 = vperm.xlu1 %1414, %v360_v36  }
  0x1c   : > { %1324 = vmatmul.mubr.msk.f32.vlgmr.msra.gmra.mrb[0].mxu0 %vm405_vm0, %v318_v18  ;;  %678 = vperm.xlu0 %1413, %v365_v20  }
  0x1d   : > { %971 = vmatprep.mubr.f32.mxu0 %v1455_v0  ;;  %663 = vperm.xlu1 %1414, %v362_v37  }
  0x20   : > { %688 = vperm.xlu0 %1413, %v367_v21  }
  0x21   : > { %673 = vperm.xlu1 %1414, %v364_v38  }
  0x24   : > { %698 = vperm.xlu0 %1413, %v369_v22  }
  0x25   : > { %683 = vperm.xlu1 %1414, %v366_v39  }
  0x28   : > { %708 = vperm.xlu0 %1413, %v371_v23  }
  0x29   : > { %693 = vperm.xlu1 %1414, %v368_v40  }
  0x2c   : > { %718 = vperm.xlu0 %1413, %v373_v24  }
  0x2d   : > { %703 = vperm.xlu1 %1414, %v370_v41  }
  0x30   : > { %728 = vperm.xlu0 %1413, %v375_v25  }
  0x31   : > { %713 = vperm.xlu1 %1414, %v372_v42  }
  0x34   : > { %738 = vperm.xlu0 %1413, %v377_v26  }
  0x35   : > { %723 = vperm.xlu1 %1414, %v374_v43  }
  0x38   : > { %748 = vperm.xlu0 %1413, %v379_v27  }
  0x39   : > { %733 = vperm.xlu1 %1414, %v376_v44  }
  0x3c   : > { %758 = vperm.xlu0 %1413, %v381_v28  }
  0x3d   : > { %743 = vperm.xlu1 %1414, %v378_v45  }
  0x40   : > { %768 = vperm.xlu0 %1413, %v383_v29  }
  0x41   : > { %753 = vperm.xlu1 %1414, %v380_v46  }
  0x44   : > { %778 = vperm.xlu0 %1413, %v385_v30  }
  0x45   : > { %763 = vperm.xlu1 %1414, %v382_v47  }
  0x48   : > { %788 = vperm.xlu0 %1413, %v387_v31  }
  0x49   : > { %773 = vperm.xlu1 %1414, %v384_v48  }
  0x4c   : > { %798 = vperm.xlu0 %1413, %v389_v32  }
  0x4d   : > { %783 = vperm.xlu1 %1414, %v386_v49  }
  0x50   : > { %808 = vperm.xlu0 %1413, %v391_v33  }
  0x51   : > { %793 = vperm.xlu1 %1414, %v388_v50  }
  0x55   : > { %803 = vperm.xlu1 %1414, %v390_v51  }
  0x87   : > { %v403_v52 = vpop.permute.xlu0 %402 }
  0x8b   : > { %v485_v63 = vpop.permute.xlu0 %484 }
  0x8f   : > { %v490_v4 = vpop.permute.xlu1 %489  ;;  %v500_v28 = vpop.permute.xlu0 %499 }
  0x94   : > { %v495_v21 = vpop.permute.xlu1 %494 }
  0xef   : > { %v475_v53 = vpop.f32.mrb[0].mxu0 }
  0xf0   : > { %v476_v54 = vadd.f32 %v475_v53, %v403_v52  ;;  %v477_v55 = vpop.f32.mrb[1].mxu0 }
  0xf1   : > { %v478_v56 = vadd.f32 %v477_v55, %v403_v52 }
  0xf2   : > { %v480_v58 = vmax.f32 %v476_v54, 0.0 }
  0xf3   : > { %v481_v57 = vmax.f32 %v478_v56, 0.0 }
  0xf5   : > { %1325 = vmatprep.subr.msk.mxu1 %vm515_vm1, %v481_v57 }
  0xf6   : > { %1326 = vmatpush1.msk.msra.mxu1 %vm515_vm1, %v480_v58 }
  0xf7   : > { %1327 = vmatmul.mubr.msk.f32.vlgmr.msra.gmra.mrb[0].mxu1 %vm502_vm2, %v319_v59 }
  0xf8   : > { %592 = vmatprep.mubr.f32.mxu1 %v1455_v0 }
  0xfb   : > { %1328 = vmatmul.mubr.msk.f32.gmra.mrb[2].mxu1 %vm502_vm2, %v320_v60 }
  0xfc   : > { %598 = vmatprep.mubr.f32.mxu1 %v1455_v0 }
  0xff   : > { %1329 = vmatmul.mubr.msk.f32.gmra.mrb[4].mxu1 %vm502_vm2, %v321_v61 }
 0x100   : > { %604 = vmatprep.mubr.f32.mxu1 %v1455_v0 }
 0x103   : > { %1330 = vmatmul.mubr.msk.f32.gmra.mrb[6].mxu1 %vm502_vm2, %v322_v62 }
 0x104   : > { %1073 = vmatprep.mubr.f32.mxu1 %v1455_v0 }
 0x1ca   : > { %v588_v1 = vpop.f32.mrb[0].mxu1 }
 0x1cb   : > { %v589_v2 = vadd.f32 %v588_v1, %v485_v63  ;;  %v590_v3 = vpop.f32.mrb[1].mxu1 }
 0x1cc   : > { %v591_v8 = vadd.f32 %v590_v3, %v485_v63 }
 0x1cd   : > { %v611_v12 = vmul.f32 0.5, %v589_v2 }
 0x1ce   : > { %v612_v13 = vmul.f32 0.5, %v591_v8  ;;  %v594_v16 = vpop.f32.mrb[2].mxu1  ;;  %v323_v8 = vld [vmem:[%s1981_s5] sm:$0xff] }
 0x1cf   : > { %1415 = vtanh.f32 %v611_v12  ;;  %v595_v17 = vadd.f32 %v594_v16, %v490_v4  ;;  %v596_v18 = vpop.f32.mrb[3].mxu1  ;;  %v342_v12 = vld [vmem:[%s1981_s5 + $0x98] sm:$0xff]  ;;  %v343_v16 = vld [vmem:[%s1981_s5 + $0xa0] sm:$0xff] }
 0x1d0   : > { %1417 = vtanh.f32 %v612_v13  ;;  %v597_v19 = vadd.f32 %v596_v18, %v490_v4  ;;  %v326_v13 = vld [vmem:[%s1981_s5 + $0x18] sm:$0xff]  ;;  %v344_v18 = vld [vmem:[%s1981_s5 + $0xa8] sm:$0xff] }
 0x1d1   : > { %v613_v20 = vmul.f32 0.5, %v595_v17  ;;  %v327_v17 = vld [vmem:[%s1981_s5 + $0x20] sm:$0xff] }
 0x1d2   : > { %v614_v22 = vmul.f32 0.5, %v597_v19  ;;  %v600_v23 = vpop.f32.mrb[4].mxu1  ;;  %v328_v19 = vld [vmem:[%s1981_s5 + $0x28] sm:$0xff] }
 0x1d3   : > { %1419 = vtanh.f32 %v613_v20  ;;  %v601_v24 = vadd.f32 %v600_v23, %v495_v21  ;;  %v602_v25 = vpop.f32.mrb[5].mxu1  ;;  %v345_v20 = vld [vmem:[%s1981_s5 + $0xb0] sm:$0xff]  ;;  %v330_v23 = vld [vmem:[%s1981_s5 + $0x38] sm:$0xff] }
 0x1d4   : > { %1421 = vtanh.f32 %v614_v22  ;;  %v603_v26 = vadd.f32 %v602_v25, %v495_v21  ;;  %v329_v21 = vld [vmem:[%s1981_s5 + $0x30] sm:$0xff]  ;;  %v346_v22 = vld [vmem:[%s1981_s5 + $0xb8] sm:$0xff]  ;;  %v331_v25 = vld [vmem:[%s1981_s5 + $0x40] sm:$0xff] }
 0x1d5   : > { %v615_v27 = vmul.f32 0.5, %v601_v24  ;;  %v347_v24 = vld [vmem:[%s1981_s5 + $0xc0] sm:$0xff] }
 0x1d6   : > { %v616_v29 = vmul.f32 0.5, %v603_v26  ;;  %v606_v30 = vpop.f32.mrb[6].mxu1  ;;  %v348_v26 = vld [vmem:[%s1981_s5 + $0xc8] sm:$0xff] }
 0x1d7   : > { %1423 = vtanh.f32 %v615_v27  ;;  %v607_v31 = vadd.f32 %v606_v30, %v500_v28  ;;  %v608_v32 = vpop.f32.mrb[7].mxu1  ;;  %v332_v27 = vld [vmem:[%s1981_s5 + $0x48] sm:$0xff]  ;;  %v350_v30 = vld [vmem:[%s1981_s5 + $0xd8] sm:$0xff] }
 0x1d8   : > { %1425 = vtanh.f32 %v616_v29  ;;  %v609_v33 = vadd.f32 %v608_v32, %v500_v28  ;;  %v349_v28 = vld [vmem:[%s1981_s5 + $0xd0] sm:$0xff]  ;;  %v351_v32 = vld [vmem:[%s1981_s5 + $0xe0] sm:$0xff] }
 0x1d9   : > { %v1416_v34 = vpop.eup %1415  ;;  %v617_v35 = vmul.f32 0.5, %v607_v31  ;;  %v333_v29 = vld [vmem:[%s1981_s5 + $0x50] sm:$0xff]  ;;  %v334_v31 = vld [vmem:[%s1981_s5 + $0x58] sm:$0xff] }
 0x1da   : > { %v1418_v36 = vpop.eup %1417  ;;  %v627_v37 = vmul.f32 0.5, %v1416_v34  ;;  %v618_v38 = vmul.f32 0.5, %v609_v33  ;;  %v335_v33 = vld [vmem:[%s1981_s5 + $0x60] sm:$0xff]  ;;  %v352_v34 = vld [vmem:[%s1981_s5 + $0xe8] sm:$0xff] }
 0x1db   : > { %v628_v39 = vmul.f32 0.5, %v1418_v36  ;;  %1427 = vtanh.f32 %v617_v35  ;;  %v336_v35 = vld [vmem:[%s1981_s5 + $0x68] sm:$0xff]  ;;  %v353_v36 = vld [vmem:[%s1981_s5 + $0xf0] sm:$0xff] }
 0x1dc   : > { %1429 = vtanh.f32 %v618_v38  ;;  %v635_v42 = vadd.f32 0.5, %v627_v37  ;;  %v337_v37 = vld [vmem:[%s1981_s5 + $0x70] sm:$0xff]  ;;  %v354_v38 = vld [vmem:[%s1981_s5 + $0xf8] sm:$0xff] }
 0x1dd   : > { %v1420_v40 = vpop.eup %1419  ;;  %v636_v44 = vadd.f32 0.5, %v628_v39  ;;  %v338_v39 = vld [vmem:[%s1981_s5 + $0x78] sm:$0xff] }
 0x1de   : > { %v1422_v41 = vpop.eup %1421  ;;  %v629_v43 = vmul.f32 0.5, %v1420_v40  ;;  %v643_v50 = vmul.f32 %v635_v42, %v1536_v7  ;;  %v339_v40 = vld [vmem:[%s1981_s5 + $0x80] sm:$0xff]  ;;  %v659_v42 = vpop.permute.xlu0 %658 }
 0x1df   : > { %v630_v45 = vmul.f32 0.5, %v1422_v41  ;;  %v644_v54 = vmul.f32 %v636_v44, %v1532_v5  ;;  %v654_v41 = vpop.permute.xlu1 %653 }
 0x1e0   : > { %v637_v46 = vadd.f32 0.5, %v629_v43 }
 0x1e1   : > { %v1424_v47 = vpop.eup %1423  ;;  %v638_v48 = vadd.f32 0.5, %v630_v45 }
 0x1e2   : > { %v1426_v49 = vpop.eup %1425  ;;  %v645_v51 = vmul.f32 %v637_v46, %v1540_v9  ;;  %v631_v52 = vmul.f32 0.5, %v1424_v47  ;;  %v669_v44 = vpop.permute.xlu0 %668 }
 0x1e3   : > { %v632_v53 = vmul.f32 0.5, %v1426_v49  ;;  %v646_v55 = vmul.f32 %v638_v48, %v1534_v6  ;;  %v664_v43 = vpop.permute.xlu1 %663 }
 0x1e4   : > { %v1377_v56 = vpack.c.bf16 %v645_v51, %v643_v50  ;;  %v639_v60 = vadd.f32 0.5, %v631_v52 }
 0x1e5   : > { %v1428_v57 = vpop.eup %1427  ;;  %v1375_v58 = vpack.c.bf16 %v646_v55, %v644_v54  ;;  %v640_v62 = vadd.f32 0.5, %v632_v53 }
 0x1e6   : > { %v1430_v59 = vpop.eup %1429  ;;  %v633_v61 = vmul.f32 0.5, %v1428_v57  ;;  %v647_v9 = vmul.f32 %v639_v60, %v1550_v14  ;;  %v340_v14 = vld [vmem:[%s1981_s5 + $0x88] sm:$0xff]  ;;  %v1847_v46 = vpop.permute.xlu0 %678 }
 0x1e7   : > { %v634_v63 = vmul.f32 0.5, %v1430_v59  ;;  %1376 = vmatprep.subr.bf16.mxu0 %v1375_v58  ;;  %1383 = vmatprep.subr.bf16.mxu1 %v1375_v58  ;;  %v648_v6 = vmul.f32 %v640_v62, %v1542_v10  ;;  %v324_v10 = vld [vmem:[%s1981_s5 + $0x8] sm:$0xff]  ;;  %v1845_v45 = vpop.permute.xlu1 %673 }
 0x1e8   : > { %v641_v1 = vadd.f32 0.5, %v633_v61  ;;  %1378 = vmatpush1.bf16.msra.mxu0 %v1377_v56  ;;  %1385 = vmatpush1.bf16.msra.mxu1 %v1377_v56 }
 0x1e9   : > { %v642_v7 = vadd.f32 0.5, %v634_v63 }
 0x1ea   : > { %v649_v5 = vmul.f32 %v641_v1, %v1552_v15  ;;  %v325_v15 = vld [vmem:[%s1981_s5 + $0x10] sm:$0xff]  ;;  %v1851_v48 = vpop.permute.xlu0 %688 }
 0x1eb   : > { %v650_v2 = vmul.f32 %v642_v7, %v1544_v11  ;;  %v341_v11 = vld [vmem:[%s1981_s5 + $0x90] sm:$0xff]  ;;  %v1849_v47 = vpop.permute.xlu1 %683 }
 0x1ec   : > { %v1381_v3 = vpack.c.bf16 %v649_v5, %v647_v9 }
 0x1ed   : > { %v1379_v4 = vpack.c.bf16 %v650_v2, %v648_v6 }
 0x1ee   : > { %v1855_v49 = vpop.permute.xlu0 %698 }
 0x1ef   : > { %1380 = vmatprep.subr.bf16.mxu0 %v1379_v4  ;;  %1384 = vmatprep.subr.bf16.mxu1 %v1379_v4 }
 0x1f0   : > { %1382 = vmatpush1.bf16.msra.mxu0 %v1381_v3  ;;  %1386 = vmatpush1.bf16.msra.mxu1 %v1381_v3 }
 0x1f2   : > { %v1859_v51 = vpop.permute.xlu0 %708 }
 0x1f3   : > { %1331 = vmatmul.mubr.msk.f32.vlgmr.msra.gmra.mrb[2].mxu0 %vm405_vm0, %v323_v8  ;;  %1348 = vmatmul.mubr.msk.f32.vlgmr.msra.gmra.mrb[8].mxu1 %vm405_vm0, %v340_v14 }
 0x1f4   : > { %977 = vmatprep.mubr.f32.mxu0 %v1455_v0  ;;  %1079 = vmatprep.mubr.f32.mxu1 %v1455_v0 }
 0x1f6   : > { %v1863_v53 = vpop.permute.xlu0 %718 }
 0x1f7   : > { %1332 = vmatmul.mubr.msk.f32.gmra.mrb[4].mxu0 %vm405_vm0, %v324_v10  ;;  %1349 = vmatmul.mubr.msk.f32.gmra.mrb[10].mxu1 %vm405_vm0, %v341_v11 }
 0x1f8   : > { %983 = vmatprep.mubr.f32.mxu0 %v1455_v0  ;;  %1085 = vmatprep.mubr.f32.mxu1 %v1455_v0 }
 0x1fa   : > { %v1867_v55 = vpop.permute.xlu0 %728 }
 0x1fb   : > { %1333 = vmatmul.mubr.msk.f32.gmra.mrb[6].mxu0 %vm405_vm0, %v325_v15  ;;  %1350 = vmatmul.mubr.msk.f32.gmra.mrb[12].mxu1 %vm405_vm0, %v342_v12 }
 0x1fc   : > { %989 = vmatprep.mubr.f32.mxu0 %v1455_v0  ;;  %1091 = vmatprep.mubr.f32.mxu1 %v1455_v0 }
 0x1fe   : > { %v739_v57 = vpop.permute.xlu0 %738 }
 0x1ff   : > { %1334 = vmatmul.mubr.msk.f32.gmra.mrb[8].mxu0 %vm405_vm0, %v326_v13  ;;  %1351 = vmatmul.mubr.msk.f32.gmra.mrb[14].mxu1 %vm405_vm0, %v343_v16 }
 0x200   : > { %995 = vmatprep.mubr.f32.mxu0 %v1455_v0  ;;  %1097 = vmatprep.mubr.f32.mxu1 %v1455_v0 }
 0x202   : > { %v749_v11 = vpop.permute.xlu0 %748 }
 0x203   : > { %1335 = vmatmul.mubr.msk.f32.gmra.mrb[10].mxu0 %vm405_vm0, %v327_v17  ;;  %1352 = vmatmul.mubr.msk.f32.gmra.mrb[16].mxu1 %vm405_vm0, %v344_v18 }
 0x204   : > { %1001 = vmatprep.mubr.f32.mxu0 %v1455_v0  ;;  %1103 = vmatprep.mubr.f32.mxu1 %v1455_v0 }
 0x207   : > { %1336 = vmatmul.mubr.msk.f32.gmra.mrb[12].mxu0 %vm405_vm0, %v328_v19  ;;  %1353 = vmatmul.mubr.msk.f32.gmra.mrb[18].mxu1 %vm405_vm0, %v345_v20 }
 0x208   : > { %1007 = vmatprep.mubr.f32.mxu0 %v1455_v0  ;;  %1109 = vmatprep.mubr.f32.mxu1 %v1455_v0 }
 0x20b   : > { %1337 = vmatmul.mubr.msk.f32.gmra.mrb[14].mxu0 %vm405_vm0, %v329_v21  ;;  %1354 = vmatmul.mubr.msk.f32.gmra.mrb[20].mxu1 %vm405_vm0, %v346_v22 }
 0x20c   : > { %1013 = vmatprep.mubr.f32.mxu0 %v1455_v0  ;;  %1115 = vmatprep.mubr.f32.mxu1 %v1455_v0 }
 0x20f   : > { %1338 = vmatmul.mubr.msk.f32.gmra.mrb[16].mxu0 %vm405_vm0, %v330_v23  ;;  %1355 = vmatmul.mubr.msk.f32.gmra.mrb[22].mxu1 %vm405_vm0, %v347_v24 }
 0x210   : > { %1019 = vmatprep.mubr.f32.mxu0 %v1455_v0  ;;  %1121 = vmatprep.mubr.f32.mxu1 %v1455_v0 }
 0x213   : > { %1339 = vmatmul.mubr.msk.f32.gmra.mrb[18].mxu0 %vm405_vm0, %v331_v25  ;;  %1356 = vmatmul.mubr.msk.f32.gmra.mrb[24].mxu1 %vm405_vm0, %v348_v26 }
 0x214   : > { %1025 = vmatprep.mubr.f32.mxu0 %v1455_v0  ;;  %1127 = vmatprep.mubr.f32.mxu1 %v1455_v0 }
 0x217   : > { %1340 = vmatmul.mubr.msk.f32.gmra.mrb[20].mxu0 %vm405_vm0, %v332_v27  ;;  %1357 = vmatmul.mubr.msk.f32.gmra.mrb[26].mxu1 %vm405_vm0, %v349_v28 }
 0x218   : > { %1031 = vmatprep.mubr.f32.mxu0 %v1455_v0  ;;  %1133 = vmatprep.mubr.f32.mxu1 %v1455_v0 }
 0x21b   : > { %1341 = vmatmul.mubr.msk.f32.gmra.mrb[22].mxu0 %vm405_vm0, %v333_v29  ;;  %1358 = vmatmul.mubr.msk.f32.gmra.mrb[28].mxu1 %vm405_vm0, %v350_v30  ;;  %v759_v30 = vpop.permute.xlu0 %758 }
 0x21c   : > { %1037 = vmatprep.mubr.f32.mxu0 %v1455_v0  ;;  %1139 = vmatprep.mubr.f32.mxu1 %v1455_v0 }
 0x21f   : > { %1342 = vmatmul.mubr.msk.f32.gmra.mrb[24].mxu0 %vm405_vm0, %v334_v31  ;;  %1359 = vmatmul.mubr.msk.f32.gmra.mrb[30].mxu1 %vm405_vm0, %v351_v32 }
 0x220   : > { %1043 = vmatprep.mubr.f32.mxu0 %v1455_v0  ;;  %1145 = vmatprep.mubr.f32.mxu1 %v1455_v0 }
 0x223   : > { %1343 = vmatmul.mubr.msk.f32.gmra.mrb[26].mxu0 %vm405_vm0, %v335_v33  ;;  %1360 = vmatmul.mubr.msk.f32.gmra.mrb[32].mxu1 %vm405_vm0, %v352_v34 }
 0x224   : > { %1049 = vmatprep.mubr.f32.mxu0 %v1455_v0  ;;  %1151 = vmatprep.mubr.f32.mxu1 %v1455_v0 }
 0x227   : > { %1344 = vmatmul.mubr.msk.f32.gmra.mrb[28].mxu0 %vm405_vm0, %v336_v35  ;;  %1361 = vmatmul.mubr.msk.f32.gmra.mrb[34].mxu1 %vm405_vm0, %v353_v36 }
 0x228   : > { %1055 = vmatprep.mubr.f32.mxu0 %v1455_v0  ;;  %1157 = vmatprep.mubr.f32.mxu1 %v1455_v0 }
 0x22b   : > { %1345 = vmatmul.mubr.msk.f32.gmra.mrb[30].mxu0 %vm405_vm0, %v337_v37  ;;  %1362 = vmatmul.mubr.msk.f32.gmra.mrb[36].mxu1 %vm405_vm0, %v354_v38 }
 0x22c   : > { %1061 = vmatprep.mubr.f32.mxu0 %v1455_v0 }
 0x22f   : > { %1346 = vmatmul.mubr.msk.f32.gmra.mrb[32].mxu0 %vm405_vm0, %v338_v39 }
 0x230   : > { %1067 = vmatprep.mubr.f32.mxu0 %v1455_v0  ;;  %v1853_v0 = vpop.permute.xlu1 %693 }
 0x233   : > { %1347 = vmatmul.mubr.msk.f32.gmra.mrb[34].mxu0 %vm405_vm0, %v339_v40 }
 0x234   : > { %v1857_v50 = vpop.permute.xlu1 %703 }
 0x238   : > { %v1861_v52 = vpop.permute.xlu1 %713 }
 0x23c   : > { %v1865_v54 = vpop.permute.xlu1 %723 }
 0x240   : > { %v1869_v56 = vpop.permute.xlu1 %733 }
 0x244   : > { %v744_v9 = vpop.permute.xlu1 %743 }
 0x248   : > { %v754_v21 = vpop.permute.xlu1 %753 }
 0x24c   : > { %v764_v39 = vpop.permute.xlu1 %763 }
 0x2c6   : > { %v973_v58 = vpop.f32.mrb[2].mxu0  ;;  %v1075_v59 = vpop.f32.mrb[8].mxu1 }
 0x2c7   : > { %v974_v60 = vadd.f32 %v973_v58, %v654_v41  ;;  %v1076_v61 = vadd.f32 %v1075_v59, %v739_v57  ;;  %v975_v62 = vpop.f32.mrb[3].mxu0  ;;  %v1077_v63 = vpop.f32.mrb[9].mxu1 }
 0x2c8   : > { %v976_v1 = vadd.f32 %v975_v62, %v654_v41  ;;  %v1078_v7 = vadd.f32 %v1077_v63, %v739_v57  ;;  %v769_v59 = vpop.permute.xlu0 %768 }
 0x2c9   : > { %1164 = vst [vmem:[%s1875_s8] sm:$0xff] %v974_v60  ;;  %1198 = vst [vmem:[%s1875_s8 + $0x110] sm:$0xff] %v1076_v61 }
 0x2ca   : > { %1165 = vst [vmem:[%s1875_s8 + $0x8] sm:$0xff] %v976_v1  ;;  %1199 = vst [vmem:[%s1875_s8 + $0x118] sm:$0xff] %v1078_v7  ;;  %v979_v5 = vpop.f32.mrb[4].mxu0  ;;  %v1081_v6 = vpop.f32.mrb[10].mxu1 }
 0x2cb   : > { %v980_v2 = vadd.f32 %v979_v5, %v659_v42  ;;  %v1082_v3 = vadd.f32 %v1081_v6, %v744_v9  ;;  %v981_v4 = vpop.f32.mrb[5].mxu0  ;;  %v1083_v8 = vpop.f32.mrb[11].mxu1 }
 0x2cc   : > { %v982_v14 = vadd.f32 %v981_v4, %v659_v42  ;;  %v1084_v10 = vadd.f32 %v1083_v8, %v744_v9  ;;  %v774_v5 = vpop.permute.xlu1 %773 }
 0x2cd   : > { %1166 = vst [vmem:[%s1875_s8 + $0x10] sm:$0xff] %v980_v2  ;;  %1200 = vst [vmem:[%s1875_s8 + $0x120] sm:$0xff] %v1082_v3 }
 0x2ce   : > { %1167 = vst [vmem:[%s1875_s8 + $0x18] sm:$0xff] %v982_v14  ;;  %1201 = vst [vmem:[%s1875_s8 + $0x128] sm:$0xff] %v1084_v10  ;;  %v985_v15 = vpop.f32.mrb[6].mxu0  ;;  %v1087_v12 = vpop.f32.mrb[12].mxu1 }
 0x2cf   : > { %v986_v13 = vadd.f32 %v985_v15, %v664_v43  ;;  %v1088_v16 = vadd.f32 %v1087_v12, %v749_v11  ;;  %v987_v17 = vpop.f32.mrb[7].mxu0  ;;  %v1089_v18 = vpop.f32.mrb[13].mxu1 }
 0x2d0   : > { %v988_v19 = vadd.f32 %v987_v17, %v664_v43  ;;  %v1090_v20 = vadd.f32 %v1089_v18, %v749_v11  ;;  %v779_v11 = vpop.permute.xlu0 %778 }
 0x2d1   : > { %1168 = vst [vmem:[%s1875_s8 + $0x20] sm:$0xff] %v986_v13  ;;  %1202 = vst [vmem:[%s1875_s8 + $0x130] sm:$0xff] %v1088_v16 }
 0x2d2   : > { %1169 = vst [vmem:[%s1875_s8 + $0x28] sm:$0xff] %v988_v19  ;;  %1203 = vst [vmem:[%s1875_s8 + $0x138] sm:$0xff] %v1090_v20  ;;  %v991_v22 = vpop.f32.mrb[8].mxu0  ;;  %v1093_v23 = vpop.f32.mrb[14].mxu1 }
 0x2d3   : > { %v992_v24 = vadd.f32 %v991_v22, %v669_v44  ;;  %v1094_v25 = vadd.f32 %v1093_v23, %v754_v21  ;;  %v993_v26 = vpop.f32.mrb[9].mxu0  ;;  %v1095_v27 = vpop.f32.mrb[15].mxu1 }
 0x2d4   : > { %v994_v28 = vadd.f32 %v993_v26, %v669_v44  ;;  %v1096_v29 = vadd.f32 %v1095_v27, %v754_v21  ;;  %v784_v20 = vpop.permute.xlu1 %783 }
 0x2d5   : > { %1170 = vst [vmem:[%s1875_s8 + $0x30] sm:$0xff] %v992_v24  ;;  %1204 = vst [vmem:[%s1875_s8 + $0x140] sm:$0xff] %v1094_v25 }
 0x2d6   : > { %1171 = vst [vmem:[%s1875_s8 + $0x38] sm:$0xff] %v994_v28  ;;  %1205 = vst [vmem:[%s1875_s8 + $0x148] sm:$0xff] %v1096_v29  ;;  %v997_v31 = vpop.f32.mrb[10].mxu0  ;;  %v1099_v32 = vpop.f32.mrb[16].mxu1 }
 0x2d7   : > { %v998_v33 = vadd.f32 %v997_v31, %v1845_v45  ;;  %v1100_v34 = vadd.f32 %v1099_v32, %v759_v30  ;;  %v999_v35 = vpop.f32.mrb[11].mxu0  ;;  %v1101_v36 = vpop.f32.mrb[17].mxu1 }
 0x2d8   : > { %v1000_v37 = vadd.f32 %v999_v35, %v1845_v45  ;;  %v1102_v38 = vadd.f32 %v1101_v36, %v759_v30  ;;  %v789_v28 = vpop.permute.xlu0 %788  ;;  %v794_v36 = vpop.permute.xlu1 %793 }
 0x2d9   : > { %1172 = vst [vmem:[%s1875_s8 + $0x40] sm:$0xff] %v998_v33  ;;  %1206 = vst [vmem:[%s1875_s8 + $0x150] sm:$0xff] %v1100_v34 }
 0x2da   : > { %1173 = vst [vmem:[%s1875_s8 + $0x48] sm:$0xff] %v1000_v37  ;;  %1207 = vst [vmem:[%s1875_s8 + $0x158] sm:$0xff] %v1102_v38  ;;  %v1003_v40 = vpop.f32.mrb[12].mxu0  ;;  %v1105_v41 = vpop.f32.mrb[18].mxu1 }
 0x2db   : > { %v1004_v42 = vadd.f32 %v1003_v40, %v1847_v46  ;;  %v1106_v43 = vadd.f32 %v1105_v41, %v764_v39  ;;  %v1005_v44 = vpop.f32.mrb[13].mxu0  ;;  %v1107_v57 = vpop.f32.mrb[19].mxu1 }
 0x2dc   : > { %v1006_v58 = vadd.f32 %v1005_v44, %v1847_v46  ;;  %v1108_v45 = vadd.f32 %v1107_v57, %v764_v39  ;;  %v799_v44 = vpop.permute.xlu0 %798 }
 0x2dd   : > { %1174 = vst [vmem:[%s1875_s8 + $0x50] sm:$0xff] %v1004_v42  ;;  %1208 = vst [vmem:[%s1875_s8 + $0x160] sm:$0xff] %v1106_v43 }
 0x2de   : > { %1175 = vst [vmem:[%s1875_s8 + $0x58] sm:$0xff] %v1006_v58  ;;  %1209 = vst [vmem:[%s1875_s8 + $0x168] sm:$0xff] %v1108_v45  ;;  %v1009_v60 = vpop.f32.mrb[14].mxu0  ;;  %v1111_v61 = vpop.f32.mrb[20].mxu1 }
 0x2df   : > { %v1010_v62 = vadd.f32 %v1009_v60, %v1849_v47  ;;  %v1112_v63 = vadd.f32 %v1111_v61, %v769_v59  ;;  %v1011_v1 = vpop.f32.mrb[15].mxu0  ;;  %v1113_v7 = vpop.f32.mrb[21].mxu1 }
 0x2e0   : > { %v1012_v9 = vadd.f32 %v1011_v1, %v1849_v47  ;;  %v1114_v46 = vadd.f32 %v1113_v7, %v769_v59 }
 0x2e1   : > { %1176 = vst [vmem:[%s1875_s8 + $0x60] sm:$0xff] %v1010_v62  ;;  %1210 = vst [vmem:[%s1875_s8 + $0x170] sm:$0xff] %v1112_v63  ;;  %v804_v63 = vpop.permute.xlu1 %803 }
 0x2e2   : > { %1177 = vst [vmem:[%s1875_s8 + $0x68] sm:$0xff] %v1012_v9  ;;  %1211 = vst [vmem:[%s1875_s8 + $0x178] sm:$0xff] %v1114_v46  ;;  %v1015_v6 = vpop.f32.mrb[16].mxu0  ;;  %v1117_v2 = vpop.f32.mrb[22].mxu1 }
 0x2e3   : > { %v1016_v3 = vadd.f32 %v1015_v6, %v1851_v48  ;;  %v1118_v4 = vadd.f32 %v1117_v2, %v774_v5  ;;  %v1017_v8 = vpop.f32.mrb[17].mxu0  ;;  %v1119_v14 = vpop.f32.mrb[23].mxu1 }
 0x2e4   : > { %v1018_v10 = vadd.f32 %v1017_v8, %v1851_v48  ;;  %v1120_v47 = vadd.f32 %v1119_v14, %v774_v5 }
 0x2e5   : > { %1178 = vst [vmem:[%s1875_s8 + $0x70] sm:$0xff] %v1016_v3  ;;  %1212 = vst [vmem:[%s1875_s8 + $0x180] sm:$0xff] %v1118_v4  ;;  %v809_v3 = vpop.permute.xlu0 %808 }
 0x2e6   : > { %1179 = vst [vmem:[%s1875_s8 + $0x78] sm:$0xff] %v1018_v10  ;;  %1213 = vst [vmem:[%s1875_s8 + $0x188] sm:$0xff] %v1120_v47  ;;  %v1021_v15 = vpop.f32.mrb[18].mxu0  ;;  %v1123_v12 = vpop.f32.mrb[24].mxu1 }
 0x2e7   : > { %v1022_v13 = vadd.f32 %v1021_v15, %v1853_v0  ;;  %v1124_v16 = vadd.f32 %v1123_v12, %v779_v11  ;;  %v1023_v17 = vpop.f32.mrb[19].mxu0  ;;  %v1125_v18 = vpop.f32.mrb[25].mxu1 }
 0x2e8   : > { %v1024_v19 = vadd.f32 %v1023_v17, %v1853_v0  ;;  %v1126_v48 = vadd.f32 %v1125_v18, %v779_v11 }
 0x2e9   : > { %1180 = vst [vmem:[%s1875_s8 + $0x80] sm:$0xff] %v1022_v13  ;;  %1214 = vst [vmem:[%s1875_s8 + $0x190] sm:$0xff] %v1124_v16 }
 0x2ea   : > { %1181 = vst [vmem:[%s1875_s8 + $0x88] sm:$0xff] %v1024_v19  ;;  %1215 = vst [vmem:[%s1875_s8 + $0x198] sm:$0xff] %v1126_v48  ;;  %v1027_v21 = vpop.f32.mrb[20].mxu0  ;;  %v1129_v22 = vpop.f32.mrb[26].mxu1 }
 0x2eb   : > { %v1028_v23 = vadd.f32 %v1027_v21, %v1855_v49  ;;  %v1130_v24 = vadd.f32 %v1129_v22, %v784_v20  ;;  %v1029_v25 = vpop.f32.mrb[21].mxu0  ;;  %v1131_v26 = vpop.f32.mrb[27].mxu1 }
 0x2ec   : > { %v1030_v27 = vadd.f32 %v1029_v25, %v1855_v49  ;;  %v1132_v0 = vadd.f32 %v1131_v26, %v784_v20 }
 0x2ed   : > { %1182 = vst [vmem:[%s1875_s8 + $0x90] sm:$0xff] %v1028_v23  ;;  %1216 = vst [vmem:[%s1875_s8 + $0x1a0] sm:$0xff] %v1130_v24 }
 0x2ee   : > { %1183 = vst [vmem:[%s1875_s8 + $0x98] sm:$0xff] %v1030_v27  ;;  %1217 = vst [vmem:[%s1875_s8 + $0x1a8] sm:$0xff] %v1132_v0  ;;  %v1033_v29 = vpop.f32.mrb[22].mxu0  ;;  %v1135_v30 = vpop.f32.mrb[28].mxu1 }
 0x2ef   : > { %v1034_v31 = vadd.f32 %v1033_v29, %v1857_v50  ;;  %v1136_v32 = vadd.f32 %v1135_v30, %v789_v28  ;;  %v1035_v33 = vpop.f32.mrb[23].mxu0  ;;  %v1137_v34 = vpop.f32.mrb[29].mxu1 }
 0x2f0   : > { %v1036_v35 = vadd.f32 %v1035_v33, %v1857_v50  ;;  %v1138_v49 = vadd.f32 %v1137_v34, %v789_v28 }
 0x2f1   : > { %1184 = vst [vmem:[%s1875_s8 + $0xa0] sm:$0xff] %v1034_v31  ;;  %1218 = vst [vmem:[%s1875_s8 + $0x1b0] sm:$0xff] %v1136_v32 }
 0x2f2   : > { %1185 = vst [vmem:[%s1875_s8 + $0xa8] sm:$0xff] %v1036_v35  ;;  %1219 = vst [vmem:[%s1875_s8 + $0x1b8] sm:$0xff] %v1138_v49  ;;  %v1039_v37 = vpop.f32.mrb[24].mxu0  ;;  %v1141_v38 = vpop.f32.mrb[30].mxu1 }
 0x2f3   : > { %v1040_v39 = vadd.f32 %v1039_v37, %v1859_v51  ;;  %v1142_v40 = vadd.f32 %v1141_v38, %v794_v36  ;;  %v1041_v41 = vpop.f32.mrb[25].mxu0  ;;  %v1143_v42 = vpop.f32.mrb[31].mxu1 }
 0x2f4   : > { %v1042_v43 = vadd.f32 %v1041_v41, %v1859_v51  ;;  %v1144_v50 = vadd.f32 %v1143_v42, %v794_v36 }
 0x2f5   : > { %1186 = vst [vmem:[%s1875_s8 + $0xb0] sm:$0xff] %v1040_v39  ;;  %1220 = vst [vmem:[%s1875_s8 + $0x1c0] sm:$0xff] %v1142_v40 }
 0x2f6   : > { %1187 = vst [vmem:[%s1875_s8 + $0xb8] sm:$0xff] %v1042_v43  ;;  %1221 = vst [vmem:[%s1875_s8 + $0x1c8] sm:$0xff] %v1144_v50  ;;  %v1045_v57 = vpop.f32.mrb[26].mxu0  ;;  %v1147_v58 = vpop.f32.mrb[32].mxu1 }
 0x2f7   : > { %v1046_v45 = vadd.f32 %v1045_v57, %v1861_v52  ;;  %v1148_v59 = vadd.f32 %v1147_v58, %v799_v44  ;;  %v1047_v60 = vpop.f32.mrb[27].mxu0  ;;  %v1149_v61 = vpop.f32.mrb[33].mxu1 }
 0x2f8   : > { %v1048_v62 = vadd.f32 %v1047_v60, %v1861_v52  ;;  %v1150_v51 = vadd.f32 %v1149_v61, %v799_v44 }
 0x2f9   : > { %1188 = vst [vmem:[%s1875_s8 + $0xc0] sm:$0xff] %v1046_v45  ;;  %1222 = vst [vmem:[%s1875_s8 + $0x1d0] sm:$0xff] %v1148_v59 }
 0x2fa   : > { %1189 = vst [vmem:[%s1875_s8 + $0xc8] sm:$0xff] %v1048_v62  ;;  %1223 = vst [vmem:[%s1875_s8 + $0x1d8] sm:$0xff] %v1150_v51  ;;  %v1051_v1 = vpop.f32.mrb[28].mxu0  ;;  %v1153_v7 = vpop.f32.mrb[34].mxu1 }
 0x2fb   : > { %v1052_v9 = vadd.f32 %v1051_v1, %v1863_v53  ;;  %v1154_v46 = vadd.f32 %v1153_v7, %v804_v63  ;;  %v1053_v5 = vpop.f32.mrb[29].mxu0  ;;  %v1155_v6 = vpop.f32.mrb[35].mxu1 }
 0x2fc   : > { %v1054_v52 = vadd.f32 %v1053_v5, %v1863_v53  ;;  %v1156_v2 = vadd.f32 %v1155_v6, %v804_v63 }
 0x2fd   : > { %1190 = vst [vmem:[%s1875_s8 + $0xd0] sm:$0xff] %v1052_v9  ;;  %1224 = vst [vmem:[%s1875_s8 + $0x1e0] sm:$0xff] %v1154_v46 }
 0x2fe   : > { %1191 = vst [vmem:[%s1875_s8 + $0xd8] sm:$0xff] %v1054_v52  ;;  %1225 = vst [vmem:[%s1875_s8 + $0x1e8] sm:$0xff] %v1156_v2  ;;  %v1057_v4 = vpop.f32.mrb[30].mxu0  ;;  %v1159_v8 = vpop.f32.mrb[36].mxu1 }
 0x2ff   : > { %v1058_v14 = vadd.f32 %v1057_v4, %v1865_v54  ;;  %v1160_v10 = vadd.f32 %v1159_v8, %v809_v3  ;;  %v1059_v47 = vpop.f32.mrb[31].mxu0  ;;  %v1161_v11 = vpop.f32.mrb[37].mxu1 }
 0x300   : > { %v1060_v53 = vadd.f32 %v1059_v47, %v1865_v54  ;;  %v1162_v15 = vadd.f32 %v1161_v11, %v809_v3 }
 0x301   : > { %1192 = vst [vmem:[%s1875_s8 + $0xe0] sm:$0xff] %v1058_v14  ;;  %1226 = vst [vmem:[%s1875_s8 + $0x1f0] sm:$0xff] %v1160_v10 }
 0x302   : > { %1193 = vst [vmem:[%s1875_s8 + $0xe8] sm:$0xff] %v1060_v53  ;;  %1227 = vst [vmem:[%s1875_s8 + $0x1f8] sm:$0xff] %v1162_v15  ;;  %v1063_v12 = vpop.f32.mrb[32].mxu0 }
 0x303   : > { %v1064_v13 = vadd.f32 %v1063_v12, %v1867_v55  ;;  %v1065_v16 = vpop.f32.mrb[33].mxu0 }
 0x304   : > { %v1066_v17 = vadd.f32 %v1065_v16, %v1867_v55 }
 0x305   : > { %1194 = vst [vmem:[%s1875_s8 + $0xf0] sm:$0xff] %v1064_v13 }
 0x306   : > { %1195 = vst [vmem:[%s1875_s8 + $0xf8] sm:$0xff] %v1066_v17  ;;  %v1069_v18 = vpop.f32.mrb[34].mxu0 }
 0x307   : > { %v1070_v19 = vadd.f32 %v1069_v18, %v1869_v56  ;;  %v1071_v48 = vpop.f32.mrb[35].mxu0 }
 0x308   : > { %v1072_v54 = vadd.f32 %v1071_v48, %v1869_v56 }
 0x309   : > { %1196 = vst [vmem:[%s1875_s8 + $0x100] sm:$0xff] %v1070_v19 }
 0x30a   : > { %1197 = vst [vmem:[%s1875_s8 + $0x108] sm:$0xff] %v1072_v54 }
 0x30b PF: > { %s17_s26 = sadd.s32 1, %s1453_s26   ;;  %s1984_s24 = smov %s1449_s25 }
 0x30c   : > { %p14_p5 = scmp.ge.s32.totalorder %s17_s26, 4   ;;  %s1985_s25 = smov %s1987_s27 }
 0x30e   :  { %16 = sbr.rel (!%p14_p5) target bundleno = 2 (0x2), region = 78 }

</bundles_post_ra>
